<compile_context>
chip_gen: v6e
topology: v6e:2x2x1
jax: 0.10.0
libtpu: 0.0.40
codegen_flags: <defaults>
</compile_context>

<pallas_src>
import math

import jax
import jax.numpy as jnp
from jax.experimental import pallas as pl
from jax.experimental.pallas import tpu as pltpu


# --------------------------------------------------------------------------- #
# Kernel: one (tm, tn) output tile, full-K reduction in a single MXU dot.
# --------------------------------------------------------------------------- #
def _bridge_kernel(x_ref, w_ref, o_ref):
    # x_ref: (tm, K), w_ref: (K, tn)  ->  o_ref: (tm, tn) = x @ w, f32 accumulate.
    o_ref[...] = jnp.dot(
        x_ref[...], w_ref[...], preferred_element_type=jnp.float32
    ).astype(o_ref.dtype)


# --------------------------------------------------------------------------- #
# Helpers
# --------------------------------------------------------------------------- #
def _sublane_pack(dtype):
    return {4: 8, 2: 16, 1: 32}.get(jnp.dtype(dtype).itemsize, 8)


def _vmem_capacity_bytes():
    try:
        cap = getattr(pltpu.get_tpu_info(), "vmem_capacity_bytes", None)
        if cap:
            return int(cap)
    except Exception:
        pass
    return 64 * 1024 * 1024  # conservative default: v7x per-TensorCore physical VMEM


def _choose_tiles(M, K, N_pad, x_bytes, w_bytes, o_bytes, pack, vmem_budget):
    """Pick (tm, tn, vmem_need).  Prefers a fully VMEM-resident weight
    (tn == N_pad, single-buffered); otherwise streams lane-dense weight panels."""
    m_aligned = pl.cdiv(max(M, 1), pack) * pack
    tn_candidates = [N_pad] + [c for c in (512, 256, 128) if c < N_pad and N_pad % c == 0]
    tm_caps = (512, 256, 128, 64, 32, 16, 8)
    best = None
    for tn in tn_candidates:
        w_bufs = 1 if tn == N_pad else 2          # resident weight -> single buffer
        for cap in tm_caps:
            tm = max(pack, (min(cap, m_aligned) // pack) * pack)
            need = (2 * tm * K * x_bytes          # double-buffered x tiles
                    + w_bufs * K * tn * w_bytes   # weight panel(s)
                    + 2 * tm * tn * o_bytes)      # double-buffered output tiles
            if best is None or need < best[2]:
                best = (tm, tn, need)
            if need <= vmem_budget:
                return tm, tn, need
    # TODO(synk): for extremely large in_dim (K) even the smallest full-K panel may
    # not fit; a K grid axis + f32 accumulator scratch would then be needed.
    return best


def xavier_uniform(key, out_dim, in_dim, dtype=jnp.float32):
    """Matches torch.nn.init.xavier_uniform_ for a (out_dim, in_dim) weight."""
    bound = math.sqrt(6.0 / (in_dim + out_dim))
    return jax.random.uniform(
        key, (out_dim, in_dim), dtype=dtype, minval=-bound, maxval=bound
    )


# --------------------------------------------------------------------------- #
# One-time weight preparation (module init, NOT per forward)
# --------------------------------------------------------------------------- #
def prepare_bridge_weight(weight, compute_dtype=None):
    """Transpose (out_dim, in_dim) -> (in_dim, out_dim_padded); pad N to a multiple
    of 128; optionally cast (e.g. to bf16) ONCE.  Returns the prepared weight."""
    out_dim, in_dim = weight.shape
    w_t = jnp.asarray(weight).T                       # (K, N): one-time transpose
    n_pad = pl.cdiv(out_dim, 128) * 128
    if n_pad != out_dim:
        w_t = jnp.pad(w_t, ((0, 0), (0, n_pad - out_dim)))
    if compute_dtype is not None:
        w_t = w_t.astype(compute_dtype)
    return w_t


# --------------------------------------------------------------------------- #
# Forward: y = x @ W.T  (nn.Linear(in_dim, out_dim, bias=False))
# --------------------------------------------------------------------------- #
def bridging_forward(x, w_t, out_dim):
    *lead, K = x.shape
    K2, N_pad = w_t.shape
    assert K == K2, f"in_dim mismatch: {K} vs {K2}"
    assert N_pad % 128 == 0 and out_dim <= N_pad

    out_dtype = x.dtype
    compute_dtype = w_t.dtype
    x2 = x.reshape(-1, K)
    if x2.dtype != compute_dtype:
        x2 = x2.astype(compute_dtype)                 # cheap vs. the cached weight cast
    M = x2.shape[0]

    x_bytes = jnp.dtype(compute_dtype).itemsize
    o_bytes = jnp.dtype(out_dtype).itemsize
    pack = max(_sublane_pack(compute_dtype), _sublane_pack(out_dtype))

    vmem_cap = _vmem_capacity_bytes()
    tm, tn, need = _choose_tiles(
        M, K, N_pad, x_bytes, x_bytes, o_bytes, pack, int(vmem_cap * 0.7))

    M_pad = pl.cdiv(max(M, 1), tm) * tm
    if M_pad != M:
        x2 = jnp.pad(x2, ((0, M_pad - M), (0, 0)))

    n_tiles_n = N_pad // tn
    n_tiles_m = M_pad // tm
    grid = (n_tiles_n, n_tiles_m)  # M innermost -> weight block constant per outer step

    w_spec_kwargs = {}
    if n_tiles_n == 1:
        # Grid-invariant weight: one VMEM copy is enough, there is no refetch to hide.
        w_spec_kwargs["pipeline_mode"] = pl.Buffered(1)

    cost = pl.CostEstimate(
        flops=2 * M_pad * N_pad * K,
        transcendentals=0,
        bytes_accessed=(n_tiles_n * M_pad * K * x_bytes     # x (re-read per N tile)
                        + K * N_pad * x_bytes               # weight read exactly once
                        + M_pad * N_pad * o_bytes),         # output write
    )
    # Right-sized VMEM limit: actual need + margin, never the full physical VMEM.
    vmem_limit = int(min(need * 1.35 + (2 << 20), vmem_cap * 0.85))
    vmem_limit = max(vmem_limit, min(need + (1 << 20), vmem_cap))

    out = pl.pallas_call(
        _bridge_kernel,
        out_shape=jax.ShapeDtypeStruct((M_pad, N_pad), out_dtype),
        grid_spec=pltpu.PrefetchScalarGridSpec(
            num_scalar_prefetch=0,
            grid=grid,
            in_specs=[
                pl.BlockSpec((tm, K), lambda j, i: (i, 0)),                  # x rows, full K
                pl.BlockSpec((K, tn), lambda j, i: (0, j), **w_spec_kwargs),  # weight panel
            ],
            out_specs=pl.BlockSpec((tm, tn), lambda j, i: (i, j)),
        ),
        compiler_params=pltpu.CompilerParams(
            dimension_semantics=("parallel", "parallel"),
            vmem_limit_bytes=vmem_limit,
        ),
        cost_estimate=cost,
    )(x2, w_t)

    if M_pad != M or N_pad != out_dim:
        out = out[:M, :out_dim]
    return out.reshape(*lead, out_dim)


# --------------------------------------------------------------------------- #
# Module wrapper: mirrors the PyTorch BridgingModule
# --------------------------------------------------------------------------- #
class BridgingModule:
    """JAX/Pallas port of the PyTorch BridgingModule: y = x @ W.T (bias=False).

    All per-weight work (transpose, N padding, optional bf16 cast) is done once
    here at init, so each forward only streams the prepared weight."""

    def __init__(self, key, in_dim=2048, out_dim=1024, compute_dtype=None):
        self.in_dim = in_dim
        self.out_dim = out_dim
        self.weight = xavier_uniform(key, out_dim, in_dim)   # PyTorch (out, in) layout
        self.w_t = prepare_bridge_weight(self.weight, compute_dtype)

    def __call__(self, x):
        return bridging_forward(x, self.w_t, self.out_dim)


if __name__ == "__main__":
    # Small shapes consistent with the module (a scaled-down 2048->1024 bridge).
    batch, in_dim, out_dim = 8, 256, 128

    key = jax.random.PRNGKey(0)
    kx, kw = jax.random.split(key)

    module = BridgingModule(kw, in_dim=in_dim, out_dim=out_dim)   # exact f32 path
    x = jax.random.normal(kx, (batch, in_dim), dtype=jnp.float32)

    y = jax.block_until_ready(module(x))

    # Sanity check against plain JAX reference (nn.Linear forward, bias=False).
    y_ref = x @ module.weight.T
    assert y.shape == (batch, out_dim)
    max_err = float(jnp.max(jnp.abs(y - y_ref)))
    assert jnp.allclose(y, y_ref, atol=1e-4, rtol=1e-4), max_err

    print("KERNEL_OK")
</pallas_src>

<mosaic_0001>
module attributes {stable_mosaic.version = 11 : i64} {
  func.func @_bridge_kernel(%arg0: i32, %arg1: i32, %arg2: memref<8x256xf32, #tpu.memory_space<vmem>>, %arg3: memref<256x128xf32, #tpu.memory_space<vmem>>, %arg4: memref<8x128xf32, #tpu.memory_space<vmem>>) attributes {dimension_semantics = [#tpu.dimension_semantics<parallel>, #tpu.dimension_semantics<parallel>], iteration_bounds = array<i64: 1, 1>, scalar_prefetch = 0 : i64, scratch_operands = 0 : i64, tpu.core_type = #tpu.core_type<tc>, window_params = [{transform_indices = @transform_0, window_bounds = array<i64: 8, 256>}, {pipeline_mode = #tpu.pipeline_mode<synchronous>, transform_indices = @transform_1, window_bounds = array<i64: 256, 128>}, {transform_indices = @transform_2, window_bounds = array<i64: 8, 128>}]} {
    %c0 = arith.constant 0 : index
    %c0_0 = arith.constant 0 : index
    %0 = vector.load %arg2[%c0, %c0_0] : memref<8x256xf32, #tpu.memory_space<vmem>>, vector<8x256xf32>
    %c0_1 = arith.constant 0 : index
    %c0_2 = arith.constant 0 : index
    %1 = vector.load %arg3[%c0_1, %c0_2] : memref<256x128xf32, #tpu.memory_space<vmem>>, vector<256x128xf32>
    %cst = arith.constant dense<0.000000e+00> : vector<8x128xf32>
    %2 = tpu.matmul %0, %1, %cst {dimension_numbers = #tpu.dot_dimension_numbers<[1], [0], [0], [1], [0, 0, 1, 1], [], []>} : vector<8x256xf32>, vector<256x128xf32>, vector<8x128xf32> -> vector<8x128xf32>
    %c0_3 = arith.constant 0 : index
    %c0_4 = arith.constant 0 : index
    %3 = vector.load %arg4[%c0_3, %c0_4] : memref<8x128xf32, #tpu.memory_space<vmem>>, vector<8x128xf32>
    tpu.vector_store %arg4[%c0_3, %c0_4], %2 {strides = array<i32>} : memref<8x128xf32, #tpu.memory_space<vmem>>, vector<8x128xf32>,
    return
  }
  func.func @transform_0(%arg0: i32, %arg1: i32) -> (i32, i32) {
    %c0_i32 = arith.constant 0 : i32
    %c0_i32_0 = arith.constant 0 : i32
    return %arg1, %c0_i32 : i32, i32
  }
  func.func @transform_1(%arg0: i32, %arg1: i32) -> (i32, i32) {
    %c0_i32 = arith.constant 0 : i32
    %c0_i32_0 = arith.constant 0 : i32
    return %c0_i32, %arg0 : i32, i32
  }
  func.func @transform_2(%arg0: i32, %arg1: i32) -> (i32, i32) {
    %c0_i32 = arith.constant 0 : i32
    return %arg1, %arg0 : i32, i32
  }
}

</mosaic_0001>

<bundles_post_ra>
// kernel: tpu_custom_call.1
= control target key start
LH: loop header
LB: loop body
LE: loop exit
PB: predicated region body
PF: predicated region fallthrough
CT: control target
= control target key end

     0   :  { %7 = vsyncpa [#allocation3], 0  ;;  %s294_s0 = inlined_call_operand.hbm [shape: f32[8,256], index: 0, kind: input, shape index: {}]   ;;  %s295_s1 = inlined_call_operand.hbm [shape: f32[256,128], index: 1, kind: input, shape index: {}]   ;;  %s296_s2 = inlined_call_operand.hbm [shape: f32[8,128], index: 2, kind: output, shape index: {}]  }
   0x1   :  { %8 = vsyncpa [#allocation6], 0 }
   0x2   :  { %9 = vsyncpa [#allocation4], 0  ;;  %s265_s9 = smov [#allocation2]   ;;  %s266_s11 = smov [#allocation5]  }
   0x3   :  { %s16_s10 = sshll.u32 %s265_s9, 4  ;;  %s25_s12 = sshll.u32 %s266_s11, 4  ;;  %s17_s10 = int_to_ptr.vmem [resolvable:$true] %s16_s10  ;;  %s26_s12 = int_to_ptr.vmem [resolvable:$true] %s25_s12 }
   0x4   :  { %s207_s13 = scalar_lea.vmem %s17_s10, 256  ;;  %p212_p1 = scmp.lt.s32.totalorder %s17_s10, %s17_s10 }
   0x5   :  { %p208_p0 = scmp.ne.s32.totalorder %s17_s10, %s207_s13  ;;  %p213_p2 = scmp.lt.s32.totalorder %s207_s13, %s207_s13 }
   0x7   :  { %p214_p3 = por %p213_p2, %p212_p1 }
   0x9   :  { %p215_p4 = pnand %p214_p3, %p208_p0 }
   0xb   :  { %218 = shalt.err (!%p215_p4)
}
   0xc   :  { %19 = dma.hbm_to_vmem [thread:$0]  %s294_s0, 256, %s17_s10, [#allocation3]  }
   0xd   :  { %s227_s16 = scalar_lea.vmem %s26_s12, 4096  ;;  %p232_p6 = scmp.lt.s32.totalorder %s26_s12, %s26_s12 }
   0xe   :  { %p228_p5 = scmp.ne.s32.totalorder %s26_s12, %s227_s16  ;;  %p233_p7 = scmp.lt.s32.totalorder %s227_s16, %s227_s16 }
  0x10   :  { %p234_p8 = por %p233_p7, %p232_p6 }
  0x12   :  { %p235_p9 = pnand %p234_p8, %p228_p5 }
  0x14   :  { %238 = shalt.err (!%p235_p9)
}
  0x15   :  { %s267_s17 = smov 128   ;;  %s268_s18 = smov 8  }
  0x16   :  { %31 = dma.hbm_to_vmem [thread:$0]  %s295_s1, 4096, %s26_s12, [#allocation6], %s267_s17, %s267_s17, %s268_s18  }
  0x17   :  { %259 = dma.done.wait [#allocation3], 256  }
  0x18   :  { %260 = vsyncadd [#allocation3], 4294967040 }
  0x19   :  { %261 = dma.done.wait [#allocation6], 4096  }
  0x1a   :  { %262 = vsyncadd [#allocation6], 4294963200  ;;  %v71_v0 = vld [vmem:[#allocation5 + $0xf8] sm:$0xff]  ;;  %v70_v2 = vld [vmem:[#allocation5 + $0xf0] sm:$0xff]  ;;  %s269_s0 = smov [#allocation7]  }
  0x1b   :  { %v55_v1 = vld [vmem:[#allocation5 + $0x78] sm:$0xff]  ;;  %159 = vmatprep.subr.mxu0 %v71_v0  ;;  %v54_v3 = vld [vmem:[#allocation5 + $0x70] sm:$0xff]  ;;  %v69_v4 = vld [vmem:[#allocation5 + $0xe8] sm:$0xff]  ;;  %s149_s1 = sshll.u32 %s269_s0, 4  ;;  %s150_s1 = int_to_ptr.vmem [resolvable:$true] %s149_s1 }
  0x1c   :  { %160 = vmatpush3.msra.mxu0 %v55_v1  ;;  %v53_v5 = vld [vmem:[#allocation5 + $0x68] sm:$0xff]  ;;  %v68_v6 = vld [vmem:[#allocation5 + $0xe0] sm:$0xff]  ;;  %v67_v8 = vld [vmem:[#allocation5 + $0xd8] sm:$0xff]  ;;  %s239_s21 = scalar_lea.vmem %s150_s1, 128  ;;  %p244_p11 = scmp.lt.s32.totalorder %s150_s1, %s150_s1 }
  0x1d   :  { %161 = vmatprep.subr.mxu0 %v70_v2  ;;  %v52_v7 = vld [vmem:[#allocation5 + $0x60] sm:$0xff]  ;;  %v51_v9 = vld [vmem:[#allocation5 + $0x58] sm:$0xff]  ;;  %v66_v10 = vld [vmem:[#allocation5 + $0xd0] sm:$0xff]  ;;  %p240_p10 = scmp.ne.s32.totalorder %s150_s1, %s239_s21  ;;  %p245_p12 = scmp.lt.s32.totalorder %s239_s21, %s239_s21 }
  0x1e   :  { %162 = vmatpush3.msra.mxu0 %v54_v3  ;;  %v50_v11 = vld [vmem:[#allocation5 + $0x50] sm:$0xff]  ;;  %v65_v12 = vld [vmem:[#allocation5 + $0xc8] sm:$0xff]  ;;  %v39_v13 = vld [vmem:[#allocation2 + $0x8] sm:$0xff] }
  0x1f   :  { %163 = vmatprep.subr.mxu0 %v69_v4  ;;  %v49_v14 = vld [vmem:[#allocation5 + $0x48] sm:$0xff]  ;;  %136 = vmatprep.mubr.f32.mxu0 %v39_v13  ;;  %v64_v15 = vld [vmem:[#allocation5 + $0xc0] sm:$0xff]  ;;  %v63_v17 = vld [vmem:[#allocation5 + $0xb8] sm:$0xff]  ;;  %p246_p13 = por %p245_p12, %p244_p11 }
  0x20   :  { %164 = vmatpush3.msra.mxu0 %v53_v5  ;;  %v48_v16 = vld [vmem:[#allocation5 + $0x40] sm:$0xff]  ;;  %v47_v18 = vld [vmem:[#allocation5 + $0x38] sm:$0xff]  ;;  %v62_v19 = vld [vmem:[#allocation5 + $0xb0] sm:$0xff] }
  0x21   :  { %165 = vmatprep.subr.mxu0 %v68_v6  ;;  %v46_v20 = vld [vmem:[#allocation5 + $0x30] sm:$0xff]  ;;  %v61_v21 = vld [vmem:[#allocation5 + $0xa8] sm:$0xff]  ;;  %v60_v23 = vld [vmem:[#allocation5 + $0xa0] sm:$0xff]  ;;  %p247_p0 = pnand %p246_p13, %p240_p10 }
  0x22   :  { %166 = vmatpush3.msra.mxu0 %v52_v7  ;;  %v45_v22 = vld [vmem:[#allocation5 + $0x28] sm:$0xff]  ;;  %v44_v24 = vld [vmem:[#allocation5 + $0x20] sm:$0xff]  ;;  %v59_v25 = vld [vmem:[#allocation5 + $0x98] sm:$0xff] }
  0x23   :  { %167 = vmatprep.subr.mxu0 %v67_v8  ;;  %v43_v26 = vld [vmem:[#allocation5 + $0x18] sm:$0xff]  ;;  %v58_v27 = vld [vmem:[#allocation5 + $0x90] sm:$0xff]  ;;  %v57_v29 = vld [vmem:[#allocation5 + $0x88] sm:$0xff] }
  0x24   :  { %168 = vmatpush3.msra.mxu0 %v51_v9  ;;  %v42_v28 = vld [vmem:[#allocation5 + $0x10] sm:$0xff]  ;;  %v41_v30 = vld [vmem:[#allocation5 + $0x8] sm:$0xff]  ;;  %v56_v31 = vld [vmem:[#allocation5 + $0x80] sm:$0xff] }
  0x25   :  { %169 = vmatprep.subr.mxu0 %v66_v10  ;;  %v40_v32 = vld [vmem:[#allocation5] sm:$0xff]  ;;  %v38_v33 = vld [vmem:[#allocation2] sm:$0xff] }
  0x26   :  { %170 = vmatpush3.msra.mxu0 %v50_v11 }
  0x27   :  { %171 = vmatprep.subr.mxu0 %v65_v12 }
  0x28   :  { %172 = vmatpush3.msra.mxu0 %v49_v14 }
  0x29   :  { %173 = vmatprep.subr.mxu0 %v64_v15 }
  0x2a   :  { %174 = vmatpush3.msra.mxu0 %v48_v16 }
  0x2b   :  { %175 = vmatprep.subr.mxu0 %v63_v17 }
  0x2c   :  { %176 = vmatpush3.msra.mxu0 %v47_v18 }
  0x2d   :  { %177 = vmatprep.subr.mxu0 %v62_v19 }
  0x2e   :  { %178 = vmatpush3.msra.mxu0 %v46_v20 }
  0x2f   :  { %179 = vmatprep.subr.mxu0 %v61_v21 }
  0x30   :  { %180 = vmatpush3.msra.mxu0 %v45_v22 }
  0x31   :  { %181 = vmatprep.subr.mxu0 %v60_v23 }
  0x32   :  { %182 = vmatpush3.msra.mxu0 %v44_v24 }
  0x33   :  { %183 = vmatprep.subr.mxu0 %v59_v25 }
  0x34   :  { %184 = vmatpush3.msra.mxu0 %v43_v26 }
  0x35   :  { %185 = vmatprep.subr.mxu0 %v58_v27 }
  0x36   :  { %186 = vmatpush3.msra.mxu0 %v42_v28 }
  0x37   :  { %187 = vmatprep.subr.mxu0 %v57_v29 }
  0x38   :  { %188 = vmatpush3.msra.mxu0 %v41_v30 }
  0x39   :  { %189 = vmatprep.subr.mxu0 %v56_v31 }
  0x3a   :  { %190 = vmatpush3.msra.mxu0 %v40_v32 }
  0x3b   :  { %137 = vmatmul.mubr.f32.vlgmr.msra.gmra.mxu0 %v38_v33 }
  0xfb   :  { %v191_v34 = vpop.f32.mrf.mxu0 }
  0xfd   :  { %v192_v35 = vpop.f32.mrf.mxu0 }
  0xfe   :  { %v193_v36 = vadd.f32 %v192_v35, %v191_v34 }
 0x100   :  { %142 = vst [vmem:[#allocation7] sm:$0xff] %v193_v36 }
 0x101   :  { %250 = shalt.err (!%p247_p0)
}
 0x102   :  { %152 = dma.vmem_to_hbm [thread:$0]  %s150_s1, 128, %s296_s2, [#allocation4]  }
 0x103   :  { %263 = dma.done.wait [#allocation4], 128  }
 0x104   :  { %264 = vsyncadd [#allocation4], 4294967168 }
 0x105   :  { %156 = vsyncpa [#allocation3], 1 }
 0x106   :  { %157 = vsyncpa [#allocation6], 1 }
 0x107   :  { %158 = vsyncpa [#allocation4], 1 }

</bundles_post_ra>
